<compile_context>
chip_gen: v6e
topology: v6e:2x2x1
jax: 0.10.0
libtpu: 0.0.40
codegen_flags: <defaults>
</compile_context>

<pallas_src>
import jax
import jax.numpy as jnp
from jax.experimental import pallas as pl
from jax.experimental.pallas import tpu as pltpu

LANES = 128


def _round_up(v, m):
    return ((v + m - 1) // m) * m


def _monotonic_encoder_kernel(x_ref, w_ref, b_ref, sel_ref, o_ref):
    # x_ref:   (block_r, 128) compute_dtype -- G batch rows packed per 128-lane row
    # w_ref:   (128, 128) compute_dtype     -- block-diagonal exp(W): G copies of (C_pad x C_pad)
    # b_ref:   (1, 128) f32                 -- bias tiled per packed group
    # sel_ref: (128, G) compute_dtype       -- segmented-mean selector (1/L at the L logit lanes)
    # o_ref:   (block_r, G) f32             -- one output value per original batch row
    z = jnp.dot(x_ref[...], w_ref[...], preferred_element_type=jnp.float32) + b_ref[...]
    # sigmoid via tanh: a single EUP push per element (vs exp + divide = two).
    sg = 0.5 * jnp.tanh(0.5 * z) + 0.5
    o_ref[...] = jnp.dot(sg.astype(sel_ref.dtype), sel_ref[...],
                         preferred_element_type=jnp.float32)


def monotonic_encoder(x, w, b, *, block_rows=8192, compute_dtype=jnp.bfloat16,
                      vmem_limit_bytes=None):
    """MonotonicEncoder forward pass.

    x: (B, C) float; w: (C, L) raw (unconstrained) weights, one column per parallel
    PMLinear layer; b: (1, L) or (L,) bias.
    Returns (B, 1) float32 == mean_l sigmoid(x @ exp(w[:, l]) + b[l]).

    compute_dtype=jnp.bfloat16 (default) halves HBM traffic on the x stream and runs
    the matmul at the bf16 MXU rate (f32 accumulation); use jnp.float32 to reproduce
    the f32 PyTorch reference to ~1e-6.
    """
    B, C = x.shape
    Cw, L = w.shape
    assert Cw == C, (Cw, C)
    b_vec = jnp.reshape(b, (-1,)).astype(jnp.float32)
    assert b_vec.shape[0] == L, (b_vec.shape, L)
    assert max(C, L) <= LANES, "TODO(synk): num_criteria > 128 needs a K-tiled variant"

    # Pad C up to a power of two (>= L) so it divides 128, then pack G rows per
    # 128-lane packed row.
    c_pad = 1
    while c_pad < max(C, L):
        c_pad *= 2
    G = LANES // c_pad

    # Batch tile: clamp block_r so the 1-D grid has ~8 steps when possible (keeps
    # both v7x TensorCores busy and the DMA pipeline > 1 deep), never exceeding
    # block_rows.  Then pad R up to a multiple of block_r so every grid step is a
    # full block (no masked tail relying on stale VMEM).
    R = pl.cdiv(B, G)                      # packed rows needed
    target_steps = 8
    block_r = min(block_rows, max(8, _round_up(pl.cdiv(R, target_steps), 8)))
    R_pad = _round_up(R, block_r)
    B_pad = R_pad * G

    x = x.astype(compute_dtype)
    if B_pad != B or c_pad != C:
        x = jnp.pad(x, ((0, B_pad - B), (0, c_pad - C)))
    xd = x.reshape(R_pad, LANES)  # free row-major reshape: lane s*c_pad + c <- x[r*G+s, c]

    # Packed parameters (tiny; computed once per call, outside the grid loop).
    ew = jnp.exp(w.astype(jnp.float32))                                   # (C, L) > 0
    blk = jnp.zeros((c_pad, c_pad), jnp.float32).at[:C, :L].set(ew)
    w_big = jnp.kron(jnp.eye(G, dtype=jnp.float32), blk).astype(compute_dtype)   # (128, 128)
    b_big = jnp.tile(
        jnp.zeros((c_pad,), jnp.float32).at[:L].set(b_vec), G
    ).reshape(1, LANES)                                                   # (1, 128) f32
    sel = jnp.kron(
        jnp.eye(G, dtype=jnp.float32),
        jnp.zeros((c_pad, 1), jnp.float32).at[:L, 0].set(1.0 / L),
    ).astype(compute_dtype)                                               # (128, G)

    # VMEM budget: 2x x tile (double buffer) + z/sg f32 intermediates + 2x out tile
    # + resident params.  Only override the 32 MiB scoped default when needed so the
    # default block_rows=8192 stays inside v7x's 64 MiB physical VMEM untouched.
    if vmem_limit_bytes is None:
        x_item = jnp.dtype(compute_dtype).itemsize
        est = (2 * block_r * LANES * x_item          # x double buffer
               + 2 * block_r * LANES * 4             # z + sg f32 intermediates
               + 2 * block_r * G * 4                 # out double buffer
               + 4 * LANES * LANES * 4)              # resident params + slack
        if est > 28 * (1 << 20):
            vmem_limit_bytes = min(100 * (1 << 20), int(est * 1.3))

    out_packed = pl.pallas_call(
        _monotonic_encoder_kernel,
        out_shape=jax.ShapeDtypeStruct((R_pad, G), jnp.float32),
        grid=(R_pad // block_r,),
        in_specs=[
            pl.BlockSpec((block_r, LANES), lambda i: (i, 0)),   # packed x, streamed
            pl.BlockSpec((LANES, LANES), lambda i: (0, 0)),     # packed weights, resident
            pl.BlockSpec((1, LANES), lambda i: (0, 0)),         # packed bias, resident
            pl.BlockSpec((LANES, G), lambda i: (0, 0)),         # mean selector, resident
        ],
        out_specs=pl.BlockSpec((block_r, G), lambda i: (i, 0)),
        compiler_params=pltpu.CompilerParams(
            dimension_semantics=("parallel",),
            vmem_limit_bytes=vmem_limit_bytes,
        ),
    )(xd, w_big, b_big, sel)

    # Free reshape back to (B, 1); padded rows are dropped.
    return out_packed.reshape(B_pad, 1)[:B]


if __name__ == "__main__":
    key = jax.random.PRNGKey(0)
    kx, kw, kb = jax.random.split(key, 3)

    # Small shapes consistent with the module's forward: (batch, num_criteria).
    # B not a multiple of 8 exercises the batch-padding path.
    B, C, L = 250, 16, 3
    x = jax.random.normal(kx, (B, C), dtype=jnp.float32)
    w = 0.1 * jax.random.normal(kw, (C, L), dtype=jnp.float32)
    b = 0.1 * jax.random.normal(kb, (1, L), dtype=jnp.float32)
    ref = jnp.mean(jax.nn.sigmoid(x @ jnp.exp(w) + b), axis=-1, keepdims=True)

    # Production (bf16 x stream) path; small explicit block_rows exercises the
    # multi-step, double-buffered grid.  bf16 operands -> relaxed tolerance.
    out = jax.block_until_ready(monotonic_encoder(x, w, b, block_rows=8))
    assert out.shape == (B, 1), out.shape
    assert jnp.allclose(out, ref, atol=3e-2, rtol=0.0), float(jnp.max(jnp.abs(out - ref)))

    # f32 path matches the PyTorch reference tightly; C=10 (not a divisor of 128)
    # exercises criteria padding.
    B2, C2 = 64, 10
    x2 = jax.random.normal(kx, (B2, C2), dtype=jnp.float32)
    w2 = 0.1 * jax.random.normal(kw, (C2, L), dtype=jnp.float32)
    b2 = 0.1 * jax.random.normal(kb, (1, L), dtype=jnp.float32)
    out2 = jax.block_until_ready(
        monotonic_encoder(x2, w2, b2, compute_dtype=jnp.float32))
    ref2 = jnp.mean(jax.nn.sigmoid(x2 @ jnp.exp(w2) + b2), axis=-1, keepdims=True)
    assert out2.shape == (B2, 1), out2.shape
    assert jnp.allclose(out2, ref2, atol=1e-5, rtol=1e-5), float(jnp.max(jnp.abs(out2 - ref2)))

    print("KERNEL_OK")
</pallas_src>

<mosaic_0001>
module attributes {stable_mosaic.version = 11 : i64} {
  func.func @_monotonic_encoder_kernel(%arg0: i32, %arg1: memref<8x128xbf16, #tpu.memory_space<vmem>>, %arg2: memref<128x128xbf16, #tpu.memory_space<vmem>>, %arg3: memref<1x128xf32, #tpu.memory_space<vmem>>, %arg4: memref<128x8xbf16, #tpu.memory_space<vmem>>, %arg5: memref<8x8xf32, #tpu.memory_space<vmem>>) attributes {dimension_semantics = [#tpu.dimension_semantics<parallel>], iteration_bounds = array<i64: 4>, scalar_prefetch = 0 : i64, scratch_operands = 0 : i64, tpu.core_type = #tpu.core_type<tc>, window_params = [{transform_indices = @transform_0, window_bounds = array<i64: 8, 128>}, {pipeline_mode = #tpu.pipeline_mode<synchronous>, transform_indices = @transform_1, window_bounds = array<i64: 128, 128>}, {pipeline_mode = #tpu.pipeline_mode<synchronous>, transform_indices = @transform_2, window_bounds = array<i64: 1, 128>}, {pipeline_mode = #tpu.pipeline_mode<synchronous>, transform_indices = @transform_3, window_bounds = array<i64: 128, 8>}, {transform_indices = @transform_4, window_bounds = array<i64: 8, 8>}]} {
    %c0 = arith.constant 0 : index
    %c0_0 = arith.constant 0 : index
    %0 = vector.load %arg1[%c0, %c0_0] : memref<8x128xbf16, #tpu.memory_space<vmem>>, vector<8x128xbf16>
    %c0_1 = arith.constant 0 : index
    %c0_2 = arith.constant 0 : index
    %1 = vector.load %arg2[%c0_1, %c0_2] : memref<128x128xbf16, #tpu.memory_space<vmem>>, vector<128x128xbf16>
    %cst = arith.constant dense<0.000000e+00> : vector<8x128xf32>
    %2 = tpu.matmul %0, %1, %cst {dimension_numbers = #tpu.dot_dimension_numbers<[1], [0], [0], [1], [0, 0, 1, 1], [], []>} : vector<8x128xbf16>, vector<128x128xbf16>, vector<8x128xf32> -> vector<8x128xf32>
    %c0_3 = arith.constant 0 : index
    %c0_4 = arith.constant 0 : index
    %3 = vector.load %arg3[%c0_3, %c0_4] : memref<1x128xf32, #tpu.memory_space<vmem>>, vector<1x128xf32>
    %4 = vector.broadcast %3 : vector<1x128xf32> to vector<8x128xf32>
    %5 = arith.addf %2, %4 : vector<8x128xf32>
    %cst_5 = arith.constant 5.000000e-01 : f32
    %6 = vector.broadcast %cst_5 : f32 to vector<8x128xf32>
    %7 = arith.mulf %6, %5 : vector<8x128xf32>
    %8 = math.tanh %7 : vector<8x128xf32>
    %cst_6 = arith.constant 5.000000e-01 : f32
    %9 = vector.broadcast %cst_6 : f32 to vector<8x128xf32>
    %10 = arith.mulf %9, %8 : vector<8x128xf32>
    %cst_7 = arith.constant 5.000000e-01 : f32
    %11 = vector.broadcast %cst_7 : f32 to vector<8x128xf32>
    %12 = arith.addf %10, %11 : vector<8x128xf32>
    %13 = arith.truncf %12 : vector<8x128xf32> to vector<8x128xbf16>
    %c0_8 = arith.constant 0 : index
    %c0_9 = arith.constant 0 : index
    %14 = vector.load %arg4[%c0_8, %c0_9] : memref<128x8xbf16, #tpu.memory_space<vmem>>, vector<128x8xbf16>
    %cst_10 = arith.constant dense<0.000000e+00> : vector<8x8xf32>
    %15 = tpu.matmul %13, %14, %cst_10 {dimension_numbers = #tpu.dot_dimension_numbers<[1], [0], [0], [1], [0, 0, 1, 1], [], []>} : vector<8x128xbf16>, vector<128x8xbf16>, vector<8x8xf32> -> vector<8x8xf32>
    %c0_11 = arith.constant 0 : index
    %c0_12 = arith.constant 0 : index
    %16 = vector.load %arg5[%c0_11, %c0_12] : memref<8x8xf32, #tpu.memory_space<vmem>>, vector<8x8xf32>
    tpu.vector_store %arg5[%c0_11, %c0_12], %15 {strides = array<i32>} : memref<8x8xf32, #tpu.memory_space<vmem>>, vector<8x8xf32>,
    return
  }
  func.func @transform_0(%arg0: i32) -> (i32, i32) {
    %c0_i32 = arith.constant 0 : i32
    %c0_i32_0 = arith.constant 0 : i32
    return %arg0, %c0_i32 : i32, i32
  }
  func.func @transform_1(%arg0: i32) -> (i32, i32) {
    %c0_i32 = arith.constant 0 : i32
    %c0_i32_0 = arith.constant 0 : i32
    %c0_i32_1 = arith.constant 0 : i32
    return %c0_i32, %c0_i32_0 : i32, i32
  }
  func.func @transform_2(%arg0: i32) -> (i32, i32) {
    %c0_i32 = arith.constant 0 : i32
    %c0_i32_0 = arith.constant 0 : i32
    %c0_i32_1 = arith.constant 0 : i32
    return %c0_i32, %c0_i32_0 : i32, i32
  }
  func.func @transform_3(%arg0: i32) -> (i32, i32) {
    %c0_i32 = arith.constant 0 : i32
    %c0_i32_0 = arith.constant 0 : i32
    %c0_i32_1 = arith.constant 0 : i32
    return %c0_i32, %c0_i32_0 : i32, i32
  }
  func.func @transform_4(%arg0: i32) -> (i32, i32) {
    %c0_i32 = arith.constant 0 : i32
    %c0_i32_0 = arith.constant 0 : i32
    return %arg0, %c0_i32 : i32, i32
  }
}

</mosaic_0001>

<bundles_post_ra>
// kernel: tpu_custom_call.1
= control target key start
LH: loop header
LB: loop body
LE: loop exit
PB: predicated region body
PF: predicated region fallthrough
CT: control target
= control target key end

     0   :  { %9 = vsyncpa [#allocation3], 0  ;;  %s894_s0 = inlined_call_operand.hbm [shape: bf16[32,128], index: 0, kind: input, shape index: {}]   ;;  %s895_s1 = inlined_call_operand.vmem [shape: bf16[128,128], index: 1, kind: input, shape index: {}]   ;;  %s896_s2 = inlined_call_operand.vmem [shape: f32[1,128], index: 2, kind: input, shape index: {}]   ;;  %s897_s3 = inlined_call_operand.vmem [shape: bf16[128,8], index: 3, kind: input, shape index: {}]   ;;  %s898_s4 = inlined_call_operand.vmem [shape: f32[32,8], index: 4, kind: output, shape index: {}]  }
   0x1   :  { %11 = vsyncpa [#allocation3 + $0x1], 0  ;;  %s738_s15 = smov 0   ;;  %s740_s16 = smov 0  }
   0x2   :  { %s742_s17 = smov 0   ;;  %s744_s18 = smov 0  }
   0x3 LB: > { %s757_s19 = sadd.s32 4294967295, %s708_s18   ;;  %s760_s20 = sadd.s32 1, %s708_s18   ;;  %s708_s18 = sphi %s744_s18, %s908_s18   ;;  %s704_s17 = sphi %s742_s17, %s907_s17   ;;  %s700_s16 = sphi %s740_s16, %s906_s16   ;;  %s696_s15 = sphi %s738_s15, %s905_s15  }
   0x4   : > { %s21_s21 = ssub.s32 %s708_s18, %s760_s20  ;;  %s24_s22 = sadd.s32 1, %s704_s17 }
   0x5   : > { %p22_p0 = scmp.eq.s32.totalorder %s21_s21, 0  ;;  %p31_p1 = scmp.ne.s32.totalorder %s704_s17, %s700_s16 }
   0x6   : > { %p32_p2 = scmp.eq.s32.totalorder %s708_s18, 0  ;;  %p37_p3 = scmp.ne.s32.totalorder %s700_s16, %s696_s15 }
   0x7   : > { %s770_s23 = scalar_select %p22_p0, %s704_s17, %s24_s22  }
   0x8   : > { %p33_p4 = por %p32_p2, %p31_p1  ;;  %p38_p5 = scmp.eq.s32.totalorder %s757_s19, 0 }
   0x9   : > { %p593_p6 = scmp.lt.s32.totalorder %s708_s18, 4  ;;  %s159_s25 = sand.u32 1, %s704_s17  }
   0xa   : > { %p774_p7 = por %p38_p5, %p37_p3  ;;  %s505_s26 = sshll.u32 %s159_s25, 2 }
   0xb   : > { %s506_s27 = sshll.u32 %s708_s18, 6  ;;  %s163_s5 = scalar_lea.vmem [#allocation2], %s505_s26 }
   0xc   : > { %s900_s24 = scalar_select %p774_p7, 1, 0 }
   0xd   : > { %s783_s30 = scalar_lea.hbm %s894_s0, %s506_s27  ;;  %s170_s6 = sshll.u32 %s163_s5, 4  ;;  %s785_s6 = int_to_ptr.vmem [resolvable:$true] %s170_s6 }
   0xe   : > { %p787_p8 = pnand %p593_p6, %p33_p4  ;;  %s160_s8 = scalar_lea.sflag [#allocation3], %s159_s25 }
   0xf   : > { %s646_s9 = scalar_lea.hbm %s783_s30, 64  ;;  %s651_s12 = scalar_lea.hbm %s894_s0, 256 }
  0x10   : > { %p647_p11 = scmp.ne.s32.totalorder %s783_s30, %s646_s9  ;;  %p648_p12 = pneg %p787_p8 }
  0x11   : > { %p652_p1 = scmp.lt.s32.totalorder %s783_s30, %s894_s0  ;;  %p653_p2 = scmp.lt.s32.totalorder %s651_s12, %s646_s9 }
  0x12   : > { %p649_p13 = pnand %p648_p12, %p647_p11 }
  0x13   : > { %p654_p3 = por %p653_p2, %p652_p1 }
  0x14   : > { %p650_p0 = pneg %p649_p13 }
  0x16   : > { %p655_p4 = pnand %p654_p3, %p650_p0 }
  0x18   : > { %658 = shalt.err (!%p655_p4)
}
  0x19   : > { %s659_s15 = scalar_lea.vmem %s785_s6, 64  ;;  %s710_s21 = smov [#allocation2]  }
  0x1a   : > { %p660_p5 = scmp.ne.s32.totalorder %s785_s6, %s659_s15  ;;  %s664_s22 = sshll.u32 %s710_s21, 4  ;;  %s665_s22 = int_to_ptr.vmem [resolvable:$false] %s664_s22 }
  0x1b   : > { %s666_s25 = scalar_lea.vmem %s665_s22, 128  ;;  %p667_p13 = scmp.lt.s32.totalorder %s785_s6, %s665_s22 }
  0x1c   : > { %p662_p6 = pnand %p660_p5, %p648_p12  ;;  %p668_p9 = scmp.lt.s32.totalorder %s666_s25, %s659_s15 }
  0x1e   : > { %p663_p11 = pneg %p662_p6  ;;  %p669_p10 = por %p668_p9, %p667_p13 }
  0x20   : > { %p670_p7 = pnand %p669_p10, %p663_p11 }
  0x22   : > { %673 = shalt.err (!%p670_p7)
}
  0x23   : > { %592 = dma.hbm_to_vmem [thread:$0]  (!%p787_p8), %s783_s30, 64, %s785_s6, %s160_s8  }
  0x24   : > { %p902_p0 = scmp.lt.s32.totalorder %s708_s18, 5  ;;  %p903_p1 = scmp.ge.s32.totalorder %s708_s18, 1 }
  0x26   : > { %p176_p12 = pnand %p903_p1, %p902_p0 }
  0x27   : > { %s181_s26 = sand.u32 (!%p176_p12), 1, %s700_s16   ;;  %p904_p7 = scmp.ne.s32.totalorder (!%p176_p12), %s900_s24, 0 }
  0x28   : > { %179 = sbr.rel (%p176_p12) target bundleno = 496 (0x1f0), region = 36  ;;  %s816_s27 = sshll.u32 (!%p176_p12), %s181_s26, 2 }
  0x29   : > { %s182_s28 = scalar_lea.sflag (!%p176_p12), [#allocation3], %s181_s26  ;;  %s185_s29 = scalar_lea.vmem (!%p176_p12), [#allocation2], %s816_s27 }
  0x2d   : > { %691 = dma.done.wait (%p904_p7), %s182_s28, 64  }
  0x2e   : > { %693 = vsyncadd (%p904_p7), %s182_s28, 4294967232  ;;  %v711_v0 = vmov 0.0   ;;  %vm712_vm0 = vmmov 0   ;;  %v628_v1 = vld [vmem:[%s895_s1 + $0x38] sm:$0xff]   ;;  %v629_v2 = vld [vmem:[%s895_s1 + $0x30] sm:$0xff]   ;;  %p209_p8 = scmp.lt.s32.totalorder %s757_s19, 3 }
  0x2f   : > { %547 = vmatprep.subr.bf16.mxu0 %v711_v0  ;;  %563 = vmatprep.mubr.msk.bf16.mxu0 %vm712_vm0, %v711_v0  ;;  %v630_v3 = vld [vmem:[%s895_s1 + $0x28] sm:$0xff]   ;;  %v636_v4 = vld [vmem:[%s897_s3 + $0x38] sm:$0xff]   ;;  %v631_v5 = vld [vmem:[%s895_s1 + $0x20] sm:$0xff]   ;;  %vm435_vm1 = vcmask 64512  }
  0x30   : > { %567 = vmatprep.subr.bf16.mxu1 %v711_v0  ;;  %583 = vmatprep.mubr.msk.bf16.mxu1 %vm712_vm0, %v711_v0  ;;  %v637_v6 = vld [vmem:[%s897_s3 + $0x30] sm:$0xff]   ;;  %v632_v7 = vld [vmem:[%s895_s1 + $0x18] sm:$0xff]   ;;  %v634_v9 = vld [vmem:[%s895_s1 + $0x8] sm:$0xff]   ;;  %s910_s19 = smov (!%p209_p8, %s757_s19), 3 }
  0x31   : > { %548 = vmatpush3.bf16.msra.mxu0 %v628_v1  ;;  %568 = vmatpush3.bf16.msra.mxu1 %v636_v4  ;;  %v633_v8 = vld [vmem:[%s895_s1 + $0x10] sm:$0xff]   ;;  %v635_v10 = vld [vmem:[%s895_s1] sm:$0xff]   ;;  %v638_v12 = vld [vmem:[%s897_s3 + $0x28] sm:$0xff]   ;;  %s509_s15 = sshll.u32 %s910_s19, 3 }
  0x32   : > { %549 = vmatprep.subr.bf16.mxu0 %v711_v0  ;;  %569 = vmatprep.subr.bf16.mxu1 %v711_v0  ;;  %v214_v11 = vld [vmem:[%s185_s29] sm:$0xf]  ;;  %v640_v14 = vld [vmem:[%s897_s3 + $0x18] sm:$0xff]   ;;  %v641_v15 = vld [vmem:[%s897_s3 + $0x10] sm:$0xff]   ;;  %s212_s25 = scalar_lea.vmem %s898_s4, %s509_s15 }
  0x33   : > { %v639_v13 = vld [vmem:[%s897_s3 + $0x20] sm:$0xff]   ;;  %v642_v16 = vld [vmem:[%s897_s3 + $0x8] sm:$0xff]  }
  0x34   : > { %v643_v17 = vld [vmem:[%s897_s3] sm:$0xff]  }
  0x35   : > { %550 = vmatpush3.bf16.msra.mxu0 %v629_v2  ;;  %570 = vmatpush3.bf16.msra.mxu1 %v637_v6  ;;  %v510_v18 = vld [vmem:[%s896_s2] ss:$0 sm:$0xff] }
  0x36   : > { %551 = vmatprep.subr.bf16.mxu0 %v711_v0  ;;  %571 = vmatprep.subr.bf16.mxu1 %v711_v0 }
  0x39   : > { %552 = vmatpush3.bf16.msra.mxu0 %v630_v3  ;;  %572 = vmatpush3.bf16.msra.mxu1 %v638_v12 }
  0x3a   : > { %553 = vmatprep.subr.bf16.mxu0 %v711_v0  ;;  %573 = vmatprep.subr.bf16.mxu1 %v711_v0 }
  0x3d   : > { %554 = vmatpush3.bf16.msra.mxu0 %v631_v5  ;;  %574 = vmatpush3.bf16.msra.mxu1 %v639_v13 }
  0x3e   : > { %555 = vmatprep.subr.bf16.mxu0 %v711_v0  ;;  %575 = vmatprep.subr.bf16.mxu1 %v711_v0 }
  0x41   : > { %556 = vmatpush3.bf16.msra.mxu0 %v632_v7  ;;  %576 = vmatpush3.bf16.msra.mxu1 %v640_v14 }
  0x42   : > { %557 = vmatprep.subr.bf16.mxu0 %v711_v0  ;;  %577 = vmatprep.subr.bf16.mxu1 %v711_v0 }
  0x45   : > { %558 = vmatpush3.bf16.msra.mxu0 %v633_v8  ;;  %578 = vmatpush3.bf16.msra.mxu1 %v641_v15 }
  0x46   : > { %559 = vmatprep.subr.bf16.mxu0 %v711_v0  ;;  %579 = vmatprep.subr.bf16.mxu1 %v711_v0 }
  0x49   : > { %560 = vmatpush3.bf16.msra.mxu0 %v634_v9  ;;  %580 = vmatpush3.bf16.msra.mxu1 %v642_v16 }
  0x4a   : > { %561 = vmatprep.subr.bf16.mxu0 %v711_v0  ;;  %581 = vmatprep.subr.bf16.mxu1 %v711_v0 }
  0x4d   : > { %562 = vmatpush3.bf16.msra.mxu0 %v635_v10  ;;  %582 = vmatpush3.bf16.msra.mxu1 %v643_v17 }
  0x50   : > { %564 = vmatmul.mubr.bf16.vlgmr.msra.gmra.mxu0 %v214_v11 }
 0x110   : > { %v320_v19 = vpop.f32.mrf.mxu0 }
 0x111   : > { %v321_v20 = vadd.f32 %v510_v18, %v320_v19 }
 0x112   : > { %v565_v21 = vpop.f32.mrf.mxu0 }
 0x113   : > { %v326_v22 = vmul.f32 0.5, %v321_v20 }
 0x114   : > { %v323_v23 = vpop.f32.mrf.mxu0 }
 0x115   : > { %644 = vtanh.f32 %v326_v22 }
 0x116   : > { %v566_v24 = vpop.f32.mrf.mxu0 }
 0x122   : > { %v645_v25 = vpop.eup %644 }
 0x123   : > { %v328_v26 = vmul.f32 0.5, %v645_v25 }
 0x125   : > { %v329_v27 = vadd.f32 0.5, %v328_v26 }
 0x127   : > { %v330_v28 = vpack.c.bf16 %v329_v27, %v329_v27 }
 0x129   : > { %584 = vmatmul.mubr.bf16.vlgmr.msra.gmra.mxu1 %v330_v28 }
 0x1e9   : > { %v429_v29 = vpop.f32.mrf.mxu1 }
 0x1ea   : > { %436 = vst.msk [vmem:[%s212_s25] sm:$0xff] %vm435_vm1, %v429_v29 }
 0x1eb   : > { %v585_v30 = vpop.f32.mrf.mxu1 }
 0x1ed   : > { %v432_v31 = vpop.f32.mrf.mxu1 }
 0x1ef   : > { %v586_v32 = vpop.f32.mrf.mxu1 }
 0x1f0 PF: > { %p14_p9 = scmp.ge.s32.totalorder %s760_s20, 6   ;;  %s905_s15 = smov %s700_s16 }
 0x1f1   : > { %s906_s16 = smov %s704_s17  ;;  %s907_s17 = smov %s770_s23 }
 0x1f2   : > { %s908_s18 = smov %s760_s20  ;;  %16 = sbr.rel (!%p14_p9) target bundleno = 3 (0x3), region = 76 }
 0x1f7   :  { %456 = vsyncpa [#allocation3], 1 }
 0x1f8   :  { %458 = vsyncpa [#allocation3 + $0x1], 1 }

</bundles_post_ra>
